<compile_context>
chip_gen: v6e
topology: v6e:2x2x1
jax: 0.10.0
libtpu: 0.0.40
codegen_flags: <defaults>
</compile_context>

<pallas_src>
import functools

import numpy as np
import jax
import jax.numpy as jnp
from jax.experimental import pallas as pl
from jax.experimental.pallas import tpu as pltpu

_EPS = 1e-5                 # nn.GroupNorm default eps
_INV_SQRT2 = 0.7071067811865476


def _erf(x):
    # Abramowitz & Stegun 7.1.26 rational approximation, |err| < 1.5e-7
    # (only mul/add/exp/where -> VPU + EUP, lowers cleanly in Mosaic).
    a1, a2, a3, a4, a5 = 0.254829592, -0.284496736, 1.421413741, -1.453152027, 1.061405429
    p = 0.3275911
    ax = jnp.abs(x)
    t = 1.0 / (1.0 + p * ax)
    poly = ((((a5 * t + a4) * t + a3) * t + a2) * t + a1) * t
    y = 1.0 - poly * jnp.exp(-ax * ax)
    return jnp.where(x >= 0.0, y, -y)


def _gelu_exact(x):
    # Matches PyTorch nn.GELU()/F.gelu default (erf-based "exact" GELU).
    return 0.5 * x * (1.0 + _erf(x * _INV_SQRT2))


def _group_norm1(h, gamma, beta):
    # GroupNorm(num_groups=1): stats over ALL (C, H*W) elems of one sample.
    # Single fused pass: var = E[x^2] - E[x]^2 (clamped against cancellation).
    n = h.size
    mean = jnp.sum(h, keepdims=True) / n
    meansq = jnp.sum(h * h, keepdims=True) / n
    var = jnp.maximum(meansq - mean * mean, 0.0)
    return (h - mean) * jax.lax.rsqrt(var + _EPS) * gamma + beta


def _double_conv_kernel(x_ref, mask_ref, w1_ref, g1_ref, b1_ref,
                        w2_ref, g2_ref, b2_ref, out_ref,
                        *, H, W, nb, residual, matmul_dtype):
    HW = H * W
    taps = tuple((dy, dx) for dy in (-1, 0, 1) for dx in (-1, 0, 1))

    # Grid-invariant loads hoisted out of the per-sample loop.
    mask = mask_ref[...]                      # (9, HW) f32, 0/1 tap validity
    w1 = w1_ref[...]                          # (Cmid, 9*Cin)  matmul dtype
    w2 = w2_ref[...]                          # (Cout, 9*Cmid) matmul dtype
    g1, b1 = g1_ref[...], b1_ref[...]         # (Cmid, 1) f32
    g2, b2 = g2_ref[...], b2_ref[...]         # (Cout, 1) f32

    def im2col(a):
        # a: (C, HW) f32.  Row k*C + c of the result holds, at lane p = y*W+x,
        # a[c, (y+dy)*W + (x+dx)] for tap k = (dy+1)*3 + (dx+1), and zero
        # outside the image (the conv's implicit 1-px zero padding).  Shifts
        # are static lane rotations (XLU); the 0/1 edge masks also kill the
        # rotation wrap-around, so no padded copy of `a` is ever materialized.
        rows = []
        for k, (dy, dx) in enumerate(taps):
            off = dy * W + dx
            if off == 0:
                rows.append(a)                                    # centre tap
            else:
                r = pltpu.roll(a, (-off) % HW, axis=1)            # r[p]=a[p+off]
                rows.append(r * mask[k:k + 1, :])
        return jnp.concatenate(rows, axis=0)                      # (9*C, HW)

    for s in range(nb):                       # static unroll, nb is small
        x_s = x_ref[s].astype(jnp.float32)                        # (Cin, HW)

        # ---- conv1: ONE MXU matmul, K = 9*Cin, lane-dense N = HW ----------
        p1 = im2col(x_s).astype(matmul_dtype)                     # (9*Cin, HW)
        acc1 = jnp.dot(w1, p1, preferred_element_type=jnp.float32)  # (Cmid, HW)
        h1 = _gelu_exact(_group_norm1(acc1, g1, b1))              # f32

        # ---- conv2: taps built straight from h1 (no intermediate scratch) --
        p2 = im2col(h1).astype(matmul_dtype)                      # (9*Cmid, HW)
        acc2 = jnp.dot(w2, p2, preferred_element_type=jnp.float32)  # (Cout, HW)
        h2 = _group_norm1(acc2, g2, b2)

        if residual:
            h2 = _gelu_exact(x_s + h2)        # f32 skip path (Cin == Cout)

        out_ref[s] = h2.astype(out_ref.dtype)   # lane-dense (Cout, HW) store


def _round_up(v, m):
    return (v + m - 1) // m * m


def _padded_bytes(shape, itemsize=4):
    # Conservative (8,128)-tiled VMEM footprint of one buffer.
    lead = 1
    for d in shape[:-2]:
        lead *= d
    sub = shape[-2] if len(shape) > 1 else 1
    lane = shape[-1]
    return lead * _round_up(sub, 8) * _round_up(lane, 128) * itemsize


def double_conv_pallas(x_nchw, params, *, residual=False, nb=None,
                       matmul_dtype=jnp.bfloat16):
    """x_nchw: (N, Cin, H, W) like the PyTorch module; returns (N, Cout, H, W).

    nb = samples per grid step.  Default keeps >= 2 grid steps (both v7x
    TensorCores busy); pass nb=N on single-core v5e/v6e to merge the batch.
    matmul_dtype: dtype the MXU sees (bf16 = native path); accumulation and
    all GroupNorm/GELU/residual math stay in f32.
    """
    w1, g1, b1, w2, g2, b2 = params
    N, Cin, H, W = x_nchw.shape
    Cmid = w1.shape[0]
    Cout = w2.shape[0]
    HW = H * W
    if residual:
        assert Cin == Cout, "residual requires in_channels == out_channels"
    if nb is None:
        nb = max(1, N // 2)                   # >= 2 "parallel" steps when N > 1
    assert N % nb == 0, "batch must be divisible by nb"
    assert HW % 128 == 0, "H*W must be a multiple of 128 (lane-tile aligned)"

    # Free reshape (no HBM pass): NCHW is already channel-major / HW-contiguous.
    x = x_nchw.reshape(N, Cin, HW)

    # PyTorch conv weight (O, I, kh, kw) -> (O, 9*I) with column (kh*3+kw)*I+i,
    # matching the tap-major row order of im2col(); cast once in the wrapper.
    w1r = jnp.transpose(w1, (0, 2, 3, 1)).reshape(Cmid, 9 * Cin).astype(matmul_dtype)
    w2r = jnp.transpose(w2, (0, 2, 3, 1)).reshape(Cout, 9 * Cmid).astype(matmul_dtype)
    g1r = g1.reshape(Cmid, 1).astype(jnp.float32)
    b1r = b1.reshape(Cmid, 1).astype(jnp.float32)
    g2r = g2.reshape(Cout, 1).astype(jnp.float32)
    b2r = b2.reshape(Cout, 1).astype(jnp.float32)

    # 3x3 tap validity masks over the flattened H*W axis (trace-time constants):
    # implement the 1-px zero padding of BOTH convs in-register.
    pos = np.arange(HW)
    yy, xx = pos // W, pos % W
    m = []
    for dy in (-1, 0, 1):
        for dx in (-1, 0, 1):
            ok = (yy + dy >= 0) & (yy + dy < H) & (xx + dx >= 0) & (xx + dx < W)
            m.append(ok)
    mask = jnp.asarray(np.stack(m, 0).astype(np.float32))         # (9, HW)

    # Scoped-VMEM limit from the (layout-padded) buffers + in-kernel working set.
    mms = jnp.dtype(matmul_dtype).itemsize
    est = (2 * _padded_bytes((nb, Cin, HW))                       # input block (dbl buf)
           + 2 * _padded_bytes((nb, Cout, HW))                    # output block (dbl buf)
           + 2 * (_padded_bytes((9, HW))
                  + _padded_bytes((Cmid, 9 * Cin), mms)
                  + _padded_bytes((Cout, 9 * Cmid), mms)
                  + 2 * _padded_bytes((Cmid, 1)) + 2 * _padded_bytes((Cout, 1)))
           + nb * (_padded_bytes((9 * Cin, HW), mms)              # live patch values
                   + _padded_bytes((9 * Cmid, HW), mms)
                   + 4 * _padded_bytes((max(Cmid, Cout), HW))))
    vmem_limit = int(min(max(4 * est, 32 * 1024 * 1024), 56 * 1024 * 1024))

    kernel = functools.partial(_double_conv_kernel, H=H, W=W, nb=nb,
                               residual=residual, matmul_dtype=matmul_dtype)

    out = pl.pallas_call(
        kernel,
        grid=(N // nb,),
        in_specs=[
            pl.BlockSpec((nb, Cin, HW), lambda i: (i, 0, 0)),
            pl.BlockSpec((9, HW), lambda i: (0, 0)),
            pl.BlockSpec((Cmid, 9 * Cin), lambda i: (0, 0)),
            pl.BlockSpec((Cmid, 1), lambda i: (0, 0)),
            pl.BlockSpec((Cmid, 1), lambda i: (0, 0)),
            pl.BlockSpec((Cout, 9 * Cmid), lambda i: (0, 0)),
            pl.BlockSpec((Cout, 1), lambda i: (0, 0)),
            pl.BlockSpec((Cout, 1), lambda i: (0, 0)),
        ],
        out_specs=pl.BlockSpec((nb, Cout, HW), lambda i: (i, 0, 0)),
        out_shape=jax.ShapeDtypeStruct((N, Cout, HW), x_nchw.dtype),
        compiler_params=pltpu.CompilerParams(
            dimension_semantics=("parallel",),
            vmem_limit_bytes=vmem_limit),
    )(x, mask, w1r, g1r, b1r, w2r, g2r, b2r)

    # Free reshape back to NCHW.
    return out.reshape(N, Cout, H, W)


# --------------------------- pure-JAX reference ------------------------------
def _ref_double_conv(x, params, residual, matmul_dtype=jnp.float32):
    w1, g1, b1, w2, g2, b2 = params

    def cast(a):  # emulate the kernel's matmul-input rounding (no-op for f32)
        return a.astype(matmul_dtype).astype(jnp.float32)

    def conv(h, w):
        return jax.lax.conv_general_dilated(cast(h), cast(w), (1, 1), ((1, 1), (1, 1)),
                                            dimension_numbers=("NCHW", "OIHW", "NCHW"))

    def gn(h, g, b):
        mean = jnp.mean(h, axis=(1, 2, 3), keepdims=True)
        var = jnp.mean((h - mean) ** 2, axis=(1, 2, 3), keepdims=True)
        hn = (h - mean) / jnp.sqrt(var + _EPS)
        return hn * g.reshape(1, -1, 1, 1) + b.reshape(1, -1, 1, 1)

    def gelu(h):
        return 0.5 * h * (1.0 + jax.scipy.special.erf(h * _INV_SQRT2))

    h = gn(conv(x, w1), g1, b1)
    h = gelu(h)
    h = gn(conv(h, w2), g2, b2)
    return gelu(x + h) if residual else h


def _make_params(key, cin, cmid, cout):
    k1, k2, k3, k4, k5, k6 = jax.random.split(key, 6)
    w1 = 0.1 * jax.random.normal(k1, (cmid, cin, 3, 3), jnp.float32)
    g1 = 1.0 + 0.1 * jax.random.normal(k2, (cmid,), jnp.float32)
    b1 = 0.1 * jax.random.normal(k3, (cmid,), jnp.float32)
    w2 = 0.1 * jax.random.normal(k4, (cout, cmid, 3, 3), jnp.float32)
    g2 = 1.0 + 0.1 * jax.random.normal(k5, (cout,), jnp.float32)
    b2 = 0.1 * jax.random.normal(k6, (cout,), jnp.float32)
    return (w1, g1, b1, w2, g2, b2)


if __name__ == "__main__":
    key = jax.random.PRNGKey(0)
    kx, kp1, kp2 = jax.random.split(key, 3)

    N, Cin, H, W = 2, 4, 16, 16
    x = jax.random.normal(kx, (N, Cin, H, W), jnp.float32)

    # Case 1: DoubleConv(4, 4, mid_channels=8, residual=True)
    #         f32 matmul path, nb=1 -> grid of 2 "parallel" steps (keeps both
    #         v7x TensorCores busy).  Exact-precision check vs the reference.
    params_res = _make_params(kp1, Cin, 8, Cin)
    out_res = jax.block_until_ready(
        double_conv_pallas(x, params_res, residual=True, nb=1,
                           matmul_dtype=jnp.float32))
    ref_res = _ref_double_conv(x, params_res, residual=True)
    assert out_res.shape == (N, Cin, H, W)
    assert jnp.allclose(out_res, ref_res, atol=1e-4, rtol=1e-4)

    # Case 2: DoubleConv(4, 6, mid_channels=8, residual=False)
    #         bf16 MXU-native matmuls, whole batch merged into one grid step
    #         (nb=2; the single-TensorCore v5e/v6e setting).  Compared against
    #         a reference that emulates the same bf16 matmul-input rounding.
    params_nores = _make_params(kp2, Cin, 8, 6)
    out_nores = jax.block_until_ready(
        double_conv_pallas(x, params_nores, residual=False, nb=2,
                           matmul_dtype=jnp.bfloat16))
    ref_nores = _ref_double_conv(x, params_nores, residual=False,
                                 matmul_dtype=jnp.bfloat16)
    assert out_nores.shape == (N, 6, H, W)
    assert jnp.allclose(out_nores, ref_nores, atol=1e-2, rtol=1e-2)

    print("KERNEL_OK")
</pallas_src>

<mosaic_0001>
module attributes {stable_mosaic.version = 11 : i64} {
  func.func @_double_conv_kernel(%arg0: i32, %arg1: memref<1x4x256xf32, #tpu.memory_space<vmem>>, %arg2: memref<9x256xf32, #tpu.memory_space<vmem>>, %arg3: memref<8x36xf32, #tpu.memory_space<vmem>>, %arg4: memref<8x1xf32, #tpu.memory_space<vmem>>, %arg5: memref<8x1xf32, #tpu.memory_space<vmem>>, %arg6: memref<4x72xf32, #tpu.memory_space<vmem>>, %arg7: memref<4x1xf32, #tpu.memory_space<vmem>>, %arg8: memref<4x1xf32, #tpu.memory_space<vmem>>, %arg9: memref<1x4x256xf32, #tpu.memory_space<vmem>>) attributes {dimension_semantics = [#tpu.dimension_semantics<parallel>], iteration_bounds = array<i64: 2>, scalar_prefetch = 0 : i64, scratch_operands = 0 : i64, tpu.core_type = #tpu.core_type<tc>, window_params = [{transform_indices = @transform_0, window_bounds = array<i64: 1, 4, 256>}, {pipeline_mode = #tpu.pipeline_mode<synchronous>, transform_indices = @transform_1, window_bounds = array<i64: 9, 256>}, {pipeline_mode = #tpu.pipeline_mode<synchronous>, transform_indices = @transform_2, window_bounds = array<i64: 8, 36>}, {pipeline_mode = #tpu.pipeline_mode<synchronous>, transform_indices = @transform_3, window_bounds = array<i64: 8, 1>}, {pipeline_mode = #tpu.pipeline_mode<synchronous>, transform_indices = @transform_4, window_bounds = array<i64: 8, 1>}, {pipeline_mode = #tpu.pipeline_mode<synchronous>, transform_indices = @transform_5, window_bounds = array<i64: 4, 72>}, {pipeline_mode = #tpu.pipeline_mode<synchronous>, transform_indices = @transform_6, window_bounds = array<i64: 4, 1>}, {pipeline_mode = #tpu.pipeline_mode<synchronous>, transform_indices = @transform_7, window_bounds = array<i64: 4, 1>}, {transform_indices = @transform_8, window_bounds = array<i64: 1, 4, 256>}]} {
    %c0 = arith.constant 0 : index
    %c0_0 = arith.constant 0 : index
    %0 = vector.load %arg2[%c0, %c0_0] : memref<9x256xf32, #tpu.memory_space<vmem>>, vector<9x256xf32>
    %c0_1 = arith.constant 0 : index
    %c0_2 = arith.constant 0 : index
    %1 = vector.load %arg3[%c0_1, %c0_2] : memref<8x36xf32, #tpu.memory_space<vmem>>, vector<8x36xf32>
    %c0_3 = arith.constant 0 : index
    %c0_4 = arith.constant 0 : index
    %2 = vector.load %arg6[%c0_3, %c0_4] : memref<4x72xf32, #tpu.memory_space<vmem>>, vector<4x72xf32>
    %c0_5 = arith.constant 0 : index
    %c0_6 = arith.constant 0 : index
    %3 = vector.load %arg4[%c0_5, %c0_6] : memref<8x1xf32, #tpu.memory_space<vmem>>, vector<8x1xf32>
    %c0_7 = arith.constant 0 : index
    %c0_8 = arith.constant 0 : index
    %4 = vector.load %arg5[%c0_7, %c0_8] : memref<8x1xf32, #tpu.memory_space<vmem>>, vector<8x1xf32>
    %c0_9 = arith.constant 0 : index
    %c0_10 = arith.constant 0 : index
    %5 = vector.load %arg7[%c0_9, %c0_10] : memref<4x1xf32, #tpu.memory_space<vmem>>, vector<4x1xf32>
    %c0_11 = arith.constant 0 : index
    %c0_12 = arith.constant 0 : index
    %6 = vector.load %arg8[%c0_11, %c0_12] : memref<4x1xf32, #tpu.memory_space<vmem>>, vector<4x1xf32>
    %c0_13 = arith.constant 0 : index
    %c0_14 = arith.constant 0 : index
    %c0_15 = arith.constant 0 : index
    %7 = vector.load %arg1[%c0_13, %c0_14, %c0_15] : memref<1x4x256xf32, #tpu.memory_space<vmem>>, vector<1x4x256xf32>
    %8 = vector.shape_cast %7 : vector<1x4x256xf32> to vector<4x256xf32>
    %c17_i32 = arith.constant 17 : i32
    %9 = tpu.dynamic_rotate %8 by %c17_i32 dim 1 : vector<4x256xf32>, i32 -> vector<4x256xf32>
    %10 = vector.extract_strided_slice %0 {offsets = [0, 0], sizes = [1, 256], strides = [1, 1]} : vector<9x256xf32> to vector<1x256xf32>
    %11 = vector.broadcast %10 : vector<1x256xf32> to vector<4x256xf32>
    %12 = arith.mulf %9, %11 : vector<4x256xf32>
    %c16_i32 = arith.constant 16 : i32
    %13 = tpu.dynamic_rotate %8 by %c16_i32 dim 1 : vector<4x256xf32>, i32 -> vector<4x256xf32>
    %14 = vector.extract_strided_slice %0 {offsets = [1, 0], sizes = [1, 256], strides = [1, 1]} : vector<9x256xf32> to vector<1x256xf32>
    %15 = vector.broadcast %14 : vector<1x256xf32> to vector<4x256xf32>
    %16 = arith.mulf %13, %15 : vector<4x256xf32>
    %c15_i32 = arith.constant 15 : i32
    %17 = tpu.dynamic_rotate %8 by %c15_i32 dim 1 : vector<4x256xf32>, i32 -> vector<4x256xf32>
    %18 = vector.extract_strided_slice %0 {offsets = [2, 0], sizes = [1, 256], strides = [1, 1]} : vector<9x256xf32> to vector<1x256xf32>
    %19 = vector.broadcast %18 : vector<1x256xf32> to vector<4x256xf32>
    %20 = arith.mulf %17, %19 : vector<4x256xf32>
    %c1_i32 = arith.constant 1 : i32
    %21 = tpu.dynamic_rotate %8 by %c1_i32 dim 1 : vector<4x256xf32>, i32 -> vector<4x256xf32>
    %22 = vector.extract_strided_slice %0 {offsets = [3, 0], sizes = [1, 256], strides = [1, 1]} : vector<9x256xf32> to vector<1x256xf32>
    %23 = vector.broadcast %22 : vector<1x256xf32> to vector<4x256xf32>
    %24 = arith.mulf %21, %23 : vector<4x256xf32>
    %c255_i32 = arith.constant 255 : i32
    %25 = tpu.dynamic_rotate %8 by %c255_i32 dim 1 : vector<4x256xf32>, i32 -> vector<4x256xf32>
    %26 = vector.extract_strided_slice %0 {offsets = [5, 0], sizes = [1, 256], strides = [1, 1]} : vector<9x256xf32> to vector<1x256xf32>
    %27 = vector.broadcast %26 : vector<1x256xf32> to vector<4x256xf32>
    %28 = arith.mulf %25, %27 : vector<4x256xf32>
    %c241_i32 = arith.constant 241 : i32
    %29 = tpu.dynamic_rotate %8 by %c241_i32 dim 1 : vector<4x256xf32>, i32 -> vector<4x256xf32>
    %30 = vector.extract_strided_slice %0 {offsets = [6, 0], sizes = [1, 256], strides = [1, 1]} : vector<9x256xf32> to vector<1x256xf32>
    %31 = vector.broadcast %30 : vector<1x256xf32> to vector<4x256xf32>
    %32 = arith.mulf %29, %31 : vector<4x256xf32>
    %c240_i32 = arith.constant 240 : i32
    %33 = tpu.dynamic_rotate %8 by %c240_i32 dim 1 : vector<4x256xf32>, i32 -> vector<4x256xf32>
    %34 = vector.extract_strided_slice %0 {offsets = [7, 0], sizes = [1, 256], strides = [1, 1]} : vector<9x256xf32> to vector<1x256xf32>
    %35 = vector.broadcast %34 : vector<1x256xf32> to vector<4x256xf32>
    %36 = arith.mulf %33, %35 : vector<4x256xf32>
    %c239_i32 = arith.constant 239 : i32
    %37 = tpu.dynamic_rotate %8 by %c239_i32 dim 1 : vector<4x256xf32>, i32 -> vector<4x256xf32>
    %38 = vector.extract_strided_slice %0 {offsets = [8, 0], sizes = [1, 256], strides = [1, 1]} : vector<9x256xf32> to vector<1x256xf32>
    %39 = vector.broadcast %38 : vector<1x256xf32> to vector<4x256xf32>
    %40 = arith.mulf %37, %39 : vector<4x256xf32>
    %41 = tpu.concatenate %12, %16, %20, %24, %8, %28, %32, %36, %40 in 0 : vector<4x256xf32>, vector<4x256xf32>, vector<4x256xf32>, vector<4x256xf32>, vector<4x256xf32>, vector<4x256xf32>, vector<4x256xf32>, vector<4x256xf32>, vector<4x256xf32> -> vector<36x256xf32>
    %cst = arith.constant dense<0.000000e+00> : vector<8x256xf32>
    %42 = tpu.matmul %1, %41, %cst {dimension_numbers = #tpu.dot_dimension_numbers<[1], [0], [0], [1], [0, 0, 1, 1], [], []>} : vector<8x36xf32>, vector<36x256xf32>, vector<8x256xf32> -> vector<8x256xf32>
    %43 = vector.shape_cast %42 : vector<8x256xf32> to vector<1x8x256xf32>
    %cst_16 = arith.constant dense<0.000000e+00> : vector<1xf32>
    %44 = vector.multi_reduction <add>, %43, %cst_16 [1, 2] : vector<1x8x256xf32> to vector<1xf32>
    %45 = vector.shape_cast %44 : vector<1xf32> to vector<1x1x1xf32>
    %46 = vector.extract %45[0, 0, 0] : f32 from vector<1x1x1xf32>
    %47 = vector.broadcast %46 : f32 to vector<1x1xf32>
    %cst_17 = arith.constant 2.048000e+03 : f32
    %48 = vector.broadcast %cst_17 : f32 to vector<1x1xf32>
    %49 = arith.divf %47, %48 : vector<1x1xf32>
    %50 = arith.mulf %42, %42 : vector<8x256xf32>
    %51 = vector.shape_cast %50 : vector<8x256xf32> to vector<1x8x256xf32>
    %cst_18 = arith.constant dense<0.000000e+00> : vector<1xf32>
    %52 = vector.multi_reduction <add>, %51, %cst_18 [1, 2] : vector<1x8x256xf32> to vector<1xf32>
    %53 = vector.shape_cast %52 : vector<1xf32> to vector<1x1x1xf32>
    %54 = vector.extract %53[0, 0, 0] : f32 from vector<1x1x1xf32>
    %55 = vector.broadcast %54 : f32 to vector<1x1xf32>
    %cst_19 = arith.constant 2.048000e+03 : f32
    %56 = vector.broadcast %cst_19 : f32 to vector<1x1xf32>
    %57 = arith.divf %55, %56 : vector<1x1xf32>
    %58 = arith.mulf %49, %49 : vector<1x1xf32>
    %59 = arith.subf %57, %58 : vector<1x1xf32>
    %cst_20 = arith.constant 0.000000e+00 : f32
    %60 = vector.broadcast %cst_20 : f32 to vector<1x1xf32>
    %61 = arith.maximumf %59, %60 : vector<1x1xf32>
    %62 = vector.broadcast %49 : vector<1x1xf32> to vector<8x256xf32>
    %63 = arith.subf %42, %62 : vector<8x256xf32>
    %cst_21 = arith.constant 9.99999974E-6 : f32
    %64 = vector.broadcast %cst_21 : f32 to vector<1x1xf32>
    %65 = arith.addf %61, %64 : vector<1x1xf32>
    %66 = math.rsqrt %65 : vector<1x1xf32>
    %67 = vector.broadcast %66 : vector<1x1xf32> to vector<8x256xf32>
    %68 = arith.mulf %63, %67 : vector<8x256xf32>
    %69 = vector.broadcast %3 : vector<8x1xf32> to vector<8x256xf32>
    %70 = arith.mulf %68, %69 : vector<8x256xf32>
    %71 = vector.broadcast %4 : vector<8x1xf32> to vector<8x256xf32>
    %72 = arith.addf %70, %71 : vector<8x256xf32>
    %cst_22 = arith.constant 5.000000e-01 : f32
    %73 = vector.broadcast %cst_22 : f32 to vector<8x256xf32>
    %74 = arith.mulf %73, %72 : vector<8x256xf32>
    %cst_23 = arith.constant 0.707106769 : f32
    %75 = vector.broadcast %cst_23 : f32 to vector<8x256xf32>
    %76 = arith.mulf %72, %75 : vector<8x256xf32>
    %77 = math.absf %76 : vector<8x256xf32>
    %cst_24 = arith.constant 0.327591091 : f32
    %78 = vector.broadcast %cst_24 : f32 to vector<8x256xf32>
    %79 = arith.mulf %78, %77 : vector<8x256xf32>
    %cst_25 = arith.constant 1.000000e+00 : f32
    %80 = vector.broadcast %cst_25 : f32 to vector<8x256xf32>
    %81 = arith.addf %80, %79 : vector<8x256xf32>
    %cst_26 = arith.constant 1.000000e+00 : f32
    %82 = vector.broadcast %cst_26 : f32 to vector<8x256xf32>
    %83 = arith.divf %82, %81 : vector<8x256xf32>
    %cst_27 = arith.constant 1.06140542 : f32
    %84 = vector.broadcast %cst_27 : f32 to vector<8x256xf32>
    %85 = arith.mulf %84, %83 : vector<8x256xf32>
    %cst_28 = arith.constant -1.45315206 : f32
    %86 = vector.broadcast %cst_28 : f32 to vector<8x256xf32>
    %87 = arith.addf %85, %86 : vector<8x256xf32>
    %88 = arith.mulf %87, %83 : vector<8x256xf32>
    %cst_29 = arith.constant 1.42141378 : f32
    %89 = vector.broadcast %cst_29 : f32 to vector<8x256xf32>
    %90 = arith.addf %88, %89 : vector<8x256xf32>
    %91 = arith.mulf %90, %83 : vector<8x256xf32>
    %cst_30 = arith.constant -0.284496725 : f32
    %92 = vector.broadcast %cst_30 : f32 to vector<8x256xf32>
    %93 = arith.addf %91, %92 : vector<8x256xf32>
    %94 = arith.mulf %93, %83 : vector<8x256xf32>
    %cst_31 = arith.constant 0.254829586 : f32
    %95 = vector.broadcast %cst_31 : f32 to vector<8x256xf32>
    %96 = arith.addf %94, %95 : vector<8x256xf32>
    %97 = arith.mulf %96, %83 : vector<8x256xf32>
    %cst_32 = arith.constant 0.000000e+00 : f32
    %98 = vector.broadcast %cst_32 : f32 to vector<8x256xf32>
    %99 = arith.subf %98, %77 : vector<8x256xf32>
    %100 = arith.mulf %99, %77 : vector<8x256xf32>
    %101 = math.exp %100 : vector<8x256xf32>
    %102 = arith.mulf %97, %101 : vector<8x256xf32>
    %cst_33 = arith.constant 1.000000e+00 : f32
    %103 = vector.broadcast %cst_33 : f32 to vector<8x256xf32>
    %104 = arith.subf %103, %102 : vector<8x256xf32>
    %cst_34 = arith.constant 0.000000e+00 : f32
    %105 = vector.broadcast %cst_34 : f32 to vector<8x256xf32>
    %106 = arith.cmpf oge, %76, %105 : vector<8x256xf32>
    %cst_35 = arith.constant 0.000000e+00 : f32
    %107 = vector.broadcast %cst_35 : f32 to vector<8x256xf32>
    %108 = arith.subf %107, %104 : vector<8x256xf32>
    %109 = arith.select %106, %104, %108 : vector<8x256xi1>, vector<8x256xf32>
    %cst_36 = arith.constant 1.000000e+00 : f32
    %110 = vector.broadcast %cst_36 : f32 to vector<8x256xf32>
    %111 = arith.addf %110, %109 : vector<8x256xf32>
    %112 = arith.mulf %74, %111 : vector<8x256xf32>
    %c17_i32_37 = arith.constant 17 : i32
    %113 = tpu.dynamic_rotate %112 by %c17_i32_37 dim 1 : vector<8x256xf32>, i32 -> vector<8x256xf32>
    %114 = vector.extract_strided_slice %0 {offsets = [0, 0], sizes = [1, 256], strides = [1, 1]} : vector<9x256xf32> to vector<1x256xf32>
    %115 = vector.broadcast %114 : vector<1x256xf32> to vector<8x256xf32>
    %116 = arith.mulf %113, %115 : vector<8x256xf32>
    %c16_i32_38 = arith.constant 16 : i32
    %117 = tpu.dynamic_rotate %112 by %c16_i32_38 dim 1 : vector<8x256xf32>, i32 -> vector<8x256xf32>
    %118 = vector.extract_strided_slice %0 {offsets = [1, 0], sizes = [1, 256], strides = [1, 1]} : vector<9x256xf32> to vector<1x256xf32>
    %119 = vector.broadcast %118 : vector<1x256xf32> to vector<8x256xf32>
    %120 = arith.mulf %117, %119 : vector<8x256xf32>
    %c15_i32_39 = arith.constant 15 : i32
    %121 = tpu.dynamic_rotate %112 by %c15_i32_39 dim 1 : vector<8x256xf32>, i32 -> vector<8x256xf32>
    %122 = vector.extract_strided_slice %0 {offsets = [2, 0], sizes = [1, 256], strides = [1, 1]} : vector<9x256xf32> to vector<1x256xf32>
    %123 = vector.broadcast %122 : vector<1x256xf32> to vector<8x256xf32>
    %124 = arith.mulf %121, %123 : vector<8x256xf32>
    %c1_i32_40 = arith.constant 1 : i32
    %125 = tpu.dynamic_rotate %112 by %c1_i32_40 dim 1 : vector<8x256xf32>, i32 -> vector<8x256xf32>
    %126 = vector.extract_strided_slice %0 {offsets = [3, 0], sizes = [1, 256], strides = [1, 1]} : vector<9x256xf32> to vector<1x256xf32>
    %127 = vector.broadcast %126 : vector<1x256xf32> to vector<8x256xf32>
    %128 = arith.mulf %125, %127 : vector<8x256xf32>
    %c255_i32_41 = arith.constant 255 : i32
    %129 = tpu.dynamic_rotate %112 by %c255_i32_41 dim 1 : vector<8x256xf32>, i32 -> vector<8x256xf32>
    %130 = vector.extract_strided_slice %0 {offsets = [5, 0], sizes = [1, 256], strides = [1, 1]} : vector<9x256xf32> to vector<1x256xf32>
    %131 = vector.broadcast %130 : vector<1x256xf32> to vector<8x256xf32>
    %132 = arith.mulf %129, %131 : vector<8x256xf32>
    %c241_i32_42 = arith.constant 241 : i32
    %133 = tpu.dynamic_rotate %112 by %c241_i32_42 dim 1 : vector<8x256xf32>, i32 -> vector<8x256xf32>
    %134 = vector.extract_strided_slice %0 {offsets = [6, 0], sizes = [1, 256], strides = [1, 1]} : vector<9x256xf32> to vector<1x256xf32>
    %135 = vector.broadcast %134 : vector<1x256xf32> to vector<8x256xf32>
    %136 = arith.mulf %133, %135 : vector<8x256xf32>
    %c240_i32_43 = arith.constant 240 : i32
    %137 = tpu.dynamic_rotate %112 by %c240_i32_43 dim 1 : vector<8x256xf32>, i32 -> vector<8x256xf32>
    %138 = vector.extract_strided_slice %0 {offsets = [7, 0], sizes = [1, 256], strides = [1, 1]} : vector<9x256xf32> to vector<1x256xf32>
    %139 = vector.broadcast %138 : vector<1x256xf32> to vector<8x256xf32>
    %140 = arith.mulf %137, %139 : vector<8x256xf32>
    %c239_i32_44 = arith.constant 239 : i32
    %141 = tpu.dynamic_rotate %112 by %c239_i32_44 dim 1 : vector<8x256xf32>, i32 -> vector<8x256xf32>
    %142 = vector.extract_strided_slice %0 {offsets = [8, 0], sizes = [1, 256], strides = [1, 1]} : vector<9x256xf32> to vector<1x256xf32>
    %143 = vector.broadcast %142 : vector<1x256xf32> to vector<8x256xf32>
    %144 = arith.mulf %141, %143 : vector<8x256xf32>
    %145 = tpu.concatenate %116, %120, %124, %128, %112, %132, %136, %140, %144 in 0 : vector<8x256xf32>, vector<8x256xf32>, vector<8x256xf32>, vector<8x256xf32>, vector<8x256xf32>, vector<8x256xf32>, vector<8x256xf32>, vector<8x256xf32>, vector<8x256xf32> -> vector<72x256xf32>
    %cst_45 = arith.constant dense<0.000000e+00> : vector<4x256xf32>
    %146 = tpu.matmul %2, %145, %cst_45 {dimension_numbers = #tpu.dot_dimension_numbers<[1], [0], [0], [1], [0, 0, 1, 1], [], []>} : vector<4x72xf32>, vector<72x256xf32>, vector<4x256xf32> -> vector<4x256xf32>
    %147 = vector.shape_cast %146 : vector<4x256xf32> to vector<1x4x256xf32>
    %cst_46 = arith.constant dense<0.000000e+00> : vector<1xf32>
    %148 = vector.multi_reduction <add>, %147, %cst_46 [1, 2] : vector<1x4x256xf32> to vector<1xf32>
    %149 = vector.shape_cast %148 : vector<1xf32> to vector<1x1x1xf32>
    %150 = vector.extract %149[0, 0, 0] : f32 from vector<1x1x1xf32>
    %151 = vector.broadcast %150 : f32 to vector<1x1xf32>
    %cst_47 = arith.constant 1.024000e+03 : f32
    %152 = vector.broadcast %cst_47 : f32 to vector<1x1xf32>
    %153 = arith.divf %151, %152 : vector<1x1xf32>
    %154 = arith.mulf %146, %146 : vector<4x256xf32>
    %155 = vector.shape_cast %154 : vector<4x256xf32> to vector<1x4x256xf32>
    %cst_48 = arith.constant dense<0.000000e+00> : vector<1xf32>
    %156 = vector.multi_reduction <add>, %155, %cst_48 [1, 2] : vector<1x4x256xf32> to vector<1xf32>
    %157 = vector.shape_cast %156 : vector<1xf32> to vector<1x1x1xf32>
    %158 = vector.extract %157[0, 0, 0] : f32 from vector<1x1x1xf32>
    %159 = vector.broadcast %158 : f32 to vector<1x1xf32>
    %cst_49 = arith.constant 1.024000e+03 : f32
    %160 = vector.broadcast %cst_49 : f32 to vector<1x1xf32>
    %161 = arith.divf %159, %160 : vector<1x1xf32>
    %162 = arith.mulf %153, %153 : vector<1x1xf32>
    %163 = arith.subf %161, %162 : vector<1x1xf32>
    %cst_50 = arith.constant 0.000000e+00 : f32
    %164 = vector.broadcast %cst_50 : f32 to vector<1x1xf32>
    %165 = arith.maximumf %163, %164 : vector<1x1xf32>
    %166 = vector.broadcast %153 : vector<1x1xf32> to vector<4x256xf32>
    %167 = arith.subf %146, %166 : vector<4x256xf32>
    %cst_51 = arith.constant 9.99999974E-6 : f32
    %168 = vector.broadcast %cst_51 : f32 to vector<1x1xf32>
    %169 = arith.addf %165, %168 : vector<1x1xf32>
    %170 = math.rsqrt %169 : vector<1x1xf32>
    %171 = vector.broadcast %170 : vector<1x1xf32> to vector<4x256xf32>
    %172 = arith.mulf %167, %171 : vector<4x256xf32>
    %173 = vector.broadcast %5 : vector<4x1xf32> to vector<4x256xf32>
    %174 = arith.mulf %172, %173 : vector<4x256xf32>
    %175 = vector.broadcast %6 : vector<4x1xf32> to vector<4x256xf32>
    %176 = arith.addf %174, %175 : vector<4x256xf32>
    %177 = arith.addf %8, %176 : vector<4x256xf32>
    %cst_52 = arith.constant 5.000000e-01 : f32
    %178 = vector.broadcast %cst_52 : f32 to vector<4x256xf32>
    %179 = arith.mulf %178, %177 : vector<4x256xf32>
    %cst_53 = arith.constant 0.707106769 : f32
    %180 = vector.broadcast %cst_53 : f32 to vector<4x256xf32>
    %181 = arith.mulf %177, %180 : vector<4x256xf32>
    %182 = math.absf %181 : vector<4x256xf32>
    %cst_54 = arith.constant 0.327591091 : f32
    %183 = vector.broadcast %cst_54 : f32 to vector<4x256xf32>
    %184 = arith.mulf %183, %182 : vector<4x256xf32>
    %cst_55 = arith.constant 1.000000e+00 : f32
    %185 = vector.broadcast %cst_55 : f32 to vector<4x256xf32>
    %186 = arith.addf %185, %184 : vector<4x256xf32>
    %cst_56 = arith.constant 1.000000e+00 : f32
    %187 = vector.broadcast %cst_56 : f32 to vector<4x256xf32>
    %188 = arith.divf %187, %186 : vector<4x256xf32>
    %cst_57 = arith.constant 1.06140542 : f32
    %189 = vector.broadcast %cst_57 : f32 to vector<4x256xf32>
    %190 = arith.mulf %189, %188 : vector<4x256xf32>
    %cst_58 = arith.constant -1.45315206 : f32
    %191 = vector.broadcast %cst_58 : f32 to vector<4x256xf32>
    %192 = arith.addf %190, %191 : vector<4x256xf32>
    %193 = arith.mulf %192, %188 : vector<4x256xf32>
    %cst_59 = arith.constant 1.42141378 : f32
    %194 = vector.broadcast %cst_59 : f32 to vector<4x256xf32>
    %195 = arith.addf %193, %194 : vector<4x256xf32>
    %196 = arith.mulf %195, %188 : vector<4x256xf32>
    %cst_60 = arith.constant -0.284496725 : f32
    %197 = vector.broadcast %cst_60 : f32 to vector<4x256xf32>
    %198 = arith.addf %196, %197 : vector<4x256xf32>
    %199 = arith.mulf %198, %188 : vector<4x256xf32>
    %cst_61 = arith.constant 0.254829586 : f32
    %200 = vector.broadcast %cst_61 : f32 to vector<4x256xf32>
    %201 = arith.addf %199, %200 : vector<4x256xf32>
    %202 = arith.mulf %201, %188 : vector<4x256xf32>
    %cst_62 = arith.constant 0.000000e+00 : f32
    %203 = vector.broadcast %cst_62 : f32 to vector<4x256xf32>
    %204 = arith.subf %203, %182 : vector<4x256xf32>
    %205 = arith.mulf %204, %182 : vector<4x256xf32>
    %206 = math.exp %205 : vector<4x256xf32>
    %207 = arith.mulf %202, %206 : vector<4x256xf32>
    %cst_63 = arith.constant 1.000000e+00 : f32
    %208 = vector.broadcast %cst_63 : f32 to vector<4x256xf32>
    %209 = arith.subf %208, %207 : vector<4x256xf32>
    %cst_64 = arith.constant 0.000000e+00 : f32
    %210 = vector.broadcast %cst_64 : f32 to vector<4x256xf32>
    %211 = arith.cmpf oge, %181, %210 : vector<4x256xf32>
    %cst_65 = arith.constant 0.000000e+00 : f32
    %212 = vector.broadcast %cst_65 : f32 to vector<4x256xf32>
    %213 = arith.subf %212, %209 : vector<4x256xf32>
    %214 = arith.select %211, %209, %213 : vector<4x256xi1>, vector<4x256xf32>
    %cst_66 = arith.constant 1.000000e+00 : f32
    %215 = vector.broadcast %cst_66 : f32 to vector<4x256xf32>
    %216 = arith.addf %215, %214 : vector<4x256xf32>
    %217 = arith.mulf %179, %216 : vector<4x256xf32>
    %c0_67 = arith.constant 0 : index
    %c0_68 = arith.constant 0 : index
    %c0_69 = arith.constant 0 : index
    %218 = vector.load %arg9[%c0_67, %c0_68, %c0_69] : memref<1x4x256xf32, #tpu.memory_space<vmem>>, vector<1x4x256xf32>
    %219 = vector.shape_cast %218 : vector<1x4x256xf32> to vector<4x256xf32>
    %220 = vector.shape_cast %217 : vector<4x256xf32> to vector<1x4x256xf32>
    tpu.vector_store %arg9[%c0_67, %c0_68, %c0_69], %220 {strides = array<i32>} : memref<1x4x256xf32, #tpu.memory_space<vmem>>, vector<1x4x256xf32>,
    return
  }
  func.func @transform_0(%arg0: i32) -> (i32, i32, i32) {
    %c0_i32 = arith.constant 0 : i32
    %c0_i32_0 = arith.constant 0 : i32
    %c0_i32_1 = arith.constant 0 : i32
    return %arg0, %c0_i32, %c0_i32_0 : i32, i32, i32
  }
  func.func @transform_1(%arg0: i32) -> (i32, i32) {
    %c0_i32 = arith.constant 0 : i32
    %c0_i32_0 = arith.constant 0 : i32
    %c0_i32_1 = arith.constant 0 : i32
    return %c0_i32, %c0_i32_0 : i32, i32
  }
  func.func @transform_2(%arg0: i32) -> (i32, i32) {
    %c0_i32 = arith.constant 0 : i32
    %c0_i32_0 = arith.constant 0 : i32
    %c0_i32_1 = arith.constant 0 : i32
    return %c0_i32, %c0_i32_0 : i32, i32
  }
  func.func @transform_3(%arg0: i32) -> (i32, i32) {
    %c0_i32 = arith.constant 0 : i32
    %c0_i32_0 = arith.constant 0 : i32
    %c0_i32_1 = arith.constant 0 : i32
    return %c0_i32, %c0_i32_0 : i32, i32
  }
  func.func @transform_4(%arg0: i32) -> (i32, i32) {
    %c0_i32 = arith.constant 0 : i32
    %c0_i32_0 = arith.constant 0 : i32
    %c0_i32_1 = arith.constant 0 : i32
    return %c0_i32, %c0_i32_0 : i32, i32
  }
  func.func @transform_5(%arg0: i32) -> (i32, i32) {
    %c0_i32 = arith.constant 0 : i32
    %c0_i32_0 = arith.constant 0 : i32
    %c0_i32_1 = arith.constant 0 : i32
    return %c0_i32, %c0_i32_0 : i32, i32
  }
  func.func @transform_6(%arg0: i32) -> (i32, i32) {
    %c0_i32 = arith.constant 0 : i32
    %c0_i32_0 = arith.constant 0 : i32
    %c0_i32_1 = arith.constant 0 : i32
    return %c0_i32, %c0_i32_0 : i32, i32
  }
  func.func @transform_7(%arg0: i32) -> (i32, i32) {
    %c0_i32 = arith.constant 0 : i32
    %c0_i32_0 = arith.constant 0 : i32
    %c0_i32_1 = arith.constant 0 : i32
    return %c0_i32, %c0_i32_0 : i32, i32
  }
  func.func @transform_8(%arg0: i32) -> (i32, i32, i32) {
    %c0_i32 = arith.constant 0 : i32
    %c0_i32_0 = arith.constant 0 : i32
    %c0_i32_1 = arith.constant 0 : i32
    return %arg0, %c0_i32, %c0_i32_0 : i32, i32, i32
  }
}

</mosaic_0001>

<bundles_post_ra>
// kernel: tpu_custom_call.1
= control target key start
LH: loop header
LB: loop body
LE: loop exit
PB: predicated region body
PF: predicated region fallthrough
CT: control target
= control target key end

     0   :  { %13 = vsyncpa [#allocation3], 0  ;;  %s1622_s0 = inlined_call_operand.vmem [shape: f32[2,4,256], index: 0, kind: input, shape index: {}]   ;;  %s1623_s1 = inlined_call_operand.hbm [shape: f32[9,256], index: 1, kind: input, shape index: {}]   ;;  %s1624_s2 = inlined_call_operand.vmem [shape: f32[8,36], index: 2, kind: input, shape index: {}]   ;;  %s1625_s3 = inlined_call_operand.vmem [shape: f32[8,1], index: 3, kind: input, shape index: {}]   ;;  %s1626_s4 = inlined_call_operand.vmem [shape: f32[8,1], index: 4, kind: input, shape index: {}]   ;;  %s1627_s5 = inlined_call_operand.vmem [shape: f32[4,72], index: 5, kind: input, shape index: {}]   ;;  %s1628_s6 = inlined_call_operand.vmem [shape: f32[4,1], index: 6, kind: input, shape index: {}]   ;;  %s1629_s7 = inlined_call_operand.vmem [shape: f32[4,1], index: 7, kind: input, shape index: {}]   ;;  %s1630_s8 = inlined_call_operand.hbm [shape: f32[2,4,256], index: 8, kind: output, shape index: {}]  }
   0x1   :  { %14 = vsyncpa [#allocation4], 0 }
   0x2   :  { %16 = vsyncpa [#allocation4 + $0x1], 0  ;;  %s1263_s27 = smov 0   ;;  %s1265_s28 = smov 0  }
   0x3   :  { %s1267_s29 = smov 0   ;;  %s1269_s30 = smov 0  }
   0x4 LB: > { %s1284_s9 = sadd.s32 4294967295, %s1202_s30   ;;  %s1001_s10 = sadd.s32 4294967294, %s1202_s30   ;;  %s1202_s30 = sphi %s1269_s30, %s1638_s30   ;;  %s1198_s29 = sphi %s1267_s29, %s1637_s29   ;;  %s1194_s28 = sphi %s1265_s28, %s1636_s28   ;;  %s1190_s27 = sphi %s1263_s27, %s1635_s27  }
   0x5   : > { %s1288_s11 = sadd.s32 1, %s1202_s30   ;;  %s202_s12 = sadd.s32 1, %s1198_s29 }
   0x6   : > { %s199_s13 = ssub.s32 %s1202_s30, %s1288_s11  ;;  %p212_p0 = scmp.ne.s32.totalorder %s1198_s29, %s1194_s28 }
   0x7   : > { %p200_p1 = scmp.eq.s32.totalorder %s199_s13, 0  ;;  %p213_p2 = scmp.eq.s32.totalorder %s1284_s9, 1 }
   0x8   : > { %p218_p3 = scmp.ne.s32.totalorder %s1194_s28, %s1190_s27  ;;  %p219_p4 = scmp.eq.s32.totalorder %s1001_s10, 1 }
   0x9   : > { %s1299_s14 = scalar_select %p200_p1, %s1198_s29, %s202_s12  }
   0xa   : > { %p1301_p5 = por %p213_p2, %p212_p0  ;;  %p1305_p6 = por %p219_p4, %p218_p3 }
   0xb   : > { %p1002_p7 = scmp.ge.s32.totalorder %s1202_s30, 1  ;;  %p226_p8 = scmp.lt.s32.totalorder %s1202_s30, 3 }
   0xc   : > { %s1632_s16 = scalar_select %p1305_p6, 1, 0 }
   0xd   : > { %p1045_p9 = scmp.eq.s32.totalorder %s1284_s9, 0  ;;  %p1312_p10 = pnand %p1002_p7, %p226_p8 }
   0xe   : > { %s1204_s18 = smov [#allocation2]  }
   0xf   : > { %s238_s19 = sshll.u32 %s1204_s18, 4  ;;  %p1037_p11 = pneg %p1312_p10  ;;  %s239_s19 = int_to_ptr.vmem [resolvable:$true] %s238_s19 }
  0x10   : > { %s1123_s20 = scalar_lea.vmem %s239_s19, 512  ;;  %p1131_p3 = scmp.lt.s32.totalorder %s239_s19, %s239_s19 }
  0x11   : > { %p1038_p12 = pnand %p1045_p9, %p1037_p11  ;;  %p1124_p0 = scmp.ne.s32.totalorder %s239_s19, %s1123_s20 }
  0x12   : > { %p1132_p4 = scmp.lt.s32.totalorder %s1123_s20, %s1123_s20 }
  0x13   : > { %p1114_p13 = pneg %p1038_p12 }
  0x14   : > { %p1133_p6 = por %p1132_p4, %p1131_p3 }
  0x15   : > { %p1126_p1 = pnand %p1124_p0, %p1114_p13 }
  0x17   : > { %p1127_p2 = pneg %p1126_p1 }
  0x19   : > { %p1134_p7 = pnand %p1133_p6, %p1127_p2 }
  0x1b   : > { %1137 = shalt.err (!%p1134_p7)
}
  0x1c   : > { %s1205_s21 = smov 256   ;;  %s1206_s22 = smov 16  }
  0x1d   : > { %1040 = dma.hbm_to_vmem [thread:$0]  (!%p1038_p12), %s1623_s1, 512, %s239_s19, [#allocation3], %s1205_s21, %s1205_s21, %s1206_s22  }
  0x1e   : > { %280 = sbr.rel (%p1312_p10) target bundleno = 1328 (0x530), region = 52 }
  0x23   : > { %1181 = dma.done.wait (%p1045_p9), [#allocation3], 512  }
  0x24   : > { %1183 = vsyncadd (%p1045_p9), [#allocation3], 4294966784  ;;  %p314_p8 = scmp.lt.s32.totalorder %s1284_s9, 1  ;;  %s1207_s18 = smov 111   ;;  %v1213_v2 = vmov 0.0   ;;  %v337_v3 = vlaneseq  ;;  %v1379_v10 = vld [vmem:[#allocation2] sm:$0xff] }
  0x25   : > { %s1208_s17 = smov 112   ;;  %s1209_s19 = smov 127   ;;  %578 = vmatprep.mubr.f32.mxu0 %v1213_v2  ;;  %821 = vmatprep.mubr.f32.mxu1 %v1213_v2  ;;  %v1381_v11 = vld [vmem:[#allocation2 + $0x10] ss:$0 sm:$0xff]  ;;  %v1383_v12 = vld [vmem:[#allocation2 + $0x8] sm:$0xff]  ;;  %vm495_vm2 = vcmask 1043456  }
  0x26   : > { %s315_s25 = scalar_select %p314_p8, %s1284_s9, 1  ;;  %v1372_v4 = vshrl.u32 %v337_v3, 7  ;;  %v1374_v5 = vand.u32 127, %v337_v3  ;;  %v1385_v13 = vld [vmem:[#allocation2 + $0x18] ss:$0 sm:$0xff]  ;;  %vm504_vm9 = vcmask 293888  }
  0x27   : > { %s1210_s20 = smov 113   ;;  %s1211_s21 = smov 1   ;;  %vm753_vm12 = vcmask 588800  }
  0x28   : > { %s1021_s26 = sshll.u32 %s315_s25, 3  ;;  %s1212_s22 = smov 16   ;;  %v446_v8 = vsub.s32 7, %v1372_v4  ;;  %vm458_vm0 = vcmp.lt.s32.totalorder %v1374_v5, 111  ;;  %v412_v9 = vsub.s32 5, %v1372_v4  ;;  %vm407_vm1 = vcmp.lt.s32.totalorder %v1374_v5, 127 }
  0x29   : > { %s318_s13 = scalar_lea.vmem %s1622_s0, %s1021_s26  ;;  %s1214_s23 = smov 15   ;;  %v429_v16 = vsub.s32 6, %v1372_v4  ;;  %vm441_vm3 = vcmp.lt.s32.totalorder %v1374_v5, 112  ;;  %vm424_vm4 = vcmp.lt.s32.totalorder %v1374_v5, 113  ;;  %v395_v42 = vsub.s32 3, %v1372_v4 }
  0x2a   : > { %v1334_v0 = vld [vmem:[%s318_s13] sm:$0xff]  ;;  %s1215_s24 = smov 17   ;;  %v1395_v19 = vrot.slane %v1379_v10, %v446_v8  ;;  %v1399_v21 = vrot.slane %v1383_v12, %v412_v9  ;;  %v1402_v22 = vrot.slane %v1383_v12, %v446_v8  ;;  %v1406_v24 = vrot.slane %v1379_v10, %v412_v9  ;;  %s311_s12 = sand.u32 1, %s1194_s28  }
  0x2b   : > { %454 = vrot.lane.b32.xlu1 %v1334_v0, %s1207_s18  ;;  %437 = vrot.lane.b32.xlu0 %v1334_v0, %s1208_s17  ;;  %v1342_v1 = vcombine.high %v1334_v0, %v1334_v0  ;;  %v1411_v27 = vrot.slane %v1379_v10, %v429_v16  ;;  %v1426_v35 = vrot.slane %v1383_v12, %v429_v16  ;;  %vm390_vm5 = vcmp.lt.s32.totalorder %v1374_v5, 1  ;;  %s1007_s13 = sshll.u32 %s311_s12, 3  ;;  %s1022_s25 = sshll.u32 %s1284_s9, 7 }
  0x2c   : > { %v1440_v52 = vrot.slane %v1379_v10, %v395_v42  ;;  %v1443_v53 = vrot.slane %v1383_v12, %v395_v42  ;;  %v361_v54 = vsub.s32 1, %v1372_v4  ;;  %v378_v58 = vsub.s32 2, %v1372_v4 }
  0x2d   : > { %vm356_vm6 = vcmp.lt.s32.totalorder %v1374_v5, 16  ;;  %v344_v62 = vsub.s32 0, %v1372_v4  ;;  %vm373_vm7 = vcmp.lt.s32.totalorder %v1374_v5, 15  ;;  %vm339_vm8 = vcmp.lt.s32.totalorder %v1374_v5, 17 }
  0x2e   : > { %v1460_v3 = vrot.slane %v1379_v10, %v361_v54  ;;  %v1216_v42 = vmov 0  }
  0x2f   : > { %403 = vrot.lane.b32.xlu0 %v1334_v0, %s1209_s19  ;;  %456 = vrot.lane.b32.xlu1 %v1342_v1, %s1207_s18  ;;  %v1481_v16 = vrot.slane %v1383_v12, %v344_v62 }
  0x30   : > { %1093 = vset.pattern.permute.xlu0 %v1216_v42  ;;  %1094 = vset.pattern.permute.xlu1 %v1216_v42 }
  0x33   : > { %405 = vrot.lane.b32.xlu1 %v1342_v1, %s1209_s19  ;;  %439 = vrot.lane.b32.xlu0 %v1342_v1, %s1208_s17 }
  0x37   : > { %422 = vrot.lane.b32.xlu1 %v1342_v1, %s1210_s20  ;;  %420 = vrot.lane.b32.xlu0 %v1334_v0, %s1210_s20 }
  0x3b   : > { %388 = vrot.lane.b32.xlu1 %v1342_v1, %s1211_s21  ;;  %386 = vrot.lane.b32.xlu0 %v1334_v0, %s1211_s21 }
  0x3f   : > { %354 = vrot.lane.b32.xlu1 %v1342_v1, %s1212_s22  ;;  %352 = vrot.lane.b32.xlu0 %v1334_v0, %s1212_s22 }
  0x43   : > { %371 = vrot.lane.b32.xlu1 %v1342_v1, %s1214_s23  ;;  %369 = vrot.lane.b32.xlu0 %v1334_v0, %s1214_s23 }
  0x47   : > { %335 = vrot.lane.b32.xlu1 %v1342_v1, %s1215_s24  ;;  %333 = vrot.lane.b32.xlu0 %v1334_v0, %s1215_s24 }
  0x9d   : > { %v455_v6 = vpop.permute.xlu1 %454  ;;  %v438_v7 = vpop.permute.xlu0 %437 }
  0xa1   : > { %v404_v14 = vpop.permute.xlu0 %403  ;;  %v457_v15 = vpop.permute.xlu1 %456 }
  0xa2   : > { %v459_v17 = vsel %vm458_vm0, %v455_v6, %v457_v15  ;;  %v460_v18 = vsel %vm458_vm0, %v457_v15, %v455_v6  ;;  %v1467_v6 = vrot.slane %v1379_v10, %v378_v58  ;;  %v1478_v15 = vrot.slane %v1379_v10, %v344_v62 }
  0xa3   : > { %v469_v20 = vmul.f32 %v1381_v11, %v459_v17  ;;  %v470_v23 = vmul.f32 %v1385_v13, %v460_v18 }
  0xa5   : > { %v406_v25 = vpop.permute.xlu1 %405  ;;  %v440_v26 = vpop.permute.xlu0 %439  ;;  %1012 = vmatprep.subr.msk.mxu0 %vm495_vm2, %v470_v23 }
  0xa6   : > { %v408_v28 = vsel %vm407_vm1, %v404_v14, %v406_v25  ;;  %v409_v29 = vsel %vm407_vm1, %v406_v25, %v404_v14  ;;  %v442_v30 = vsel %vm441_vm3, %v438_v7, %v440_v26  ;;  %v443_v31 = vsel %vm441_vm3, %v440_v26, %v438_v7  ;;  %1013 = vmatpush1.msk.msra.mxu0 %vm495_vm2, %v469_v20 }
  0xa7   : > { %v419_v32 = vmul.f32 %v1399_v21, %v409_v29  ;;  %v452_v33 = vmul.f32 %v1395_v19, %v442_v30  ;;  %v453_v34 = vmul.f32 %v1402_v22, %v443_v31  ;;  %v418_v36 = vmul.f32 %v1406_v24, %v408_v28 }
  0xa8   : > { %v1470_v7 = vrot.slane %v1383_v12, %v378_v58 }
  0xa9   : > { %v423_v37 = vpop.permute.xlu1 %422  ;;  %v421_v38 = vpop.permute.xlu0 %420  ;;  %v486_v39 = vrot.slane %v419_v32, 4  ;;  %v491_v43 = vrot.slane %v452_v33, 4  ;;  %v492_v44 = vrot.slane %v453_v34, 4  ;;  %v485_v47 = vrot.slane %v418_v36, 4 }
  0xaa   : > { %v425_v40 = vsel %vm424_vm4, %v421_v38, %v423_v37  ;;  %v426_v41 = vsel %vm424_vm4, %v423_v37, %v421_v38 }
  0xab   : > { %v435_v45 = vmul.f32 %v1411_v27, %v425_v40  ;;  %v436_v46 = vmul.f32 %v1426_v35, %v426_v41  ;;  %v501_v57 = vsel %vm495_vm2, %v1342_v1, %v486_v39  ;;  %v500_v59 = vsel %vm495_vm2, %v1334_v0, %v485_v47  ;;  %v323_v41 = vld [vmem:[%s1624_s2] sm:$0xff] }
  0xac   : > { %v1463_v1 = vrot.slane %v1383_v12, %v361_v54 }
  0xad   : > { %v389_v48 = vpop.permute.xlu1 %388  ;;  %v387_v49 = vpop.permute.xlu0 %386  ;;  %v503_v50 = vsel %vm495_vm2, %v436_v46, %v492_v44  ;;  %v502_v51 = vsel %vm495_vm2, %v435_v45, %v491_v43 }
  0xae   : > { %538 = vmatprep.subr.mxu0 %v503_v50  ;;  %v391_v55 = vsel %vm390_vm5, %v387_v49, %v389_v48  ;;  %v392_v56 = vsel %vm390_vm5, %v389_v48, %v387_v49  ;;  %v326_v49 = vld [vmem:[%s1626_s4] sm:$0xff] }
  0xaf   : > { %539 = vmatpush1.msra.mxu0 %v502_v51  ;;  %v401_v63 = vmul.f32 %v1440_v52, %v392_v56  ;;  %v402_v2 = vmul.f32 %v1443_v53, %v391_v55  ;;  %v325_v50 = vld [vmem:[%s1625_s3] sm:$0xff] }
  0xb0   : > { %540 = vmatprep.subr.mxu0 %v501_v57 }
  0xb1   : > { %v355_v60 = vpop.permute.xlu1 %354  ;;  %v353_v61 = vpop.permute.xlu0 %352  ;;  %541 = vmatpush1.msra.mxu0 %v500_v59  ;;  %v479_v17 = vrot.slane %v401_v63, 4  ;;  %v480_v18 = vrot.slane %v402_v2, 4 }
  0xb2   : > { %v357_v4 = vsel %vm356_vm6, %v353_v61, %v355_v60  ;;  %v358_v8 = vsel %vm356_vm6, %v355_v60, %v353_v61 }
  0xb3   : > { %v367_v25 = vmul.f32 %v1460_v3, %v358_v8  ;;  %v368_v26 = vmul.f32 %v1463_v1, %v357_v4 }
  0xb5   : > { %v372_v9 = vpop.permute.xlu1 %371  ;;  %v370_v14 = vpop.permute.xlu0 %369  ;;  %v473_v34 = vrot.slane %v367_v25, 4  ;;  %v474_v36 = vrot.slane %v368_v26, 4 }
  0xb6   : > { %v374_v20 = vsel %vm373_vm7, %v370_v14, %v372_v9  ;;  %v375_v23 = vsel %vm373_vm7, %v372_v9, %v370_v14 }
  0xb7   : > { %v384_v28 = vmul.f32 %v1467_v6, %v375_v23  ;;  %v385_v10 = vmul.f32 %v1470_v7, %v374_v20 }
  0xb9   : > { %v336_v29 = vpop.permute.xlu1 %335  ;;  %v334_v30 = vpop.permute.xlu0 %333  ;;  %v499_v12 = vsel %vm495_vm2, %v385_v10, %v480_v18  ;;  %v498_v31 = vsel %vm495_vm2, %v384_v28, %v479_v17 }
  0xba   : > { %v340_v32 = vsel %vm339_vm8, %v334_v30, %v336_v29  ;;  %v341_v33 = vsel %vm339_vm8, %v336_v29, %v334_v30  ;;  %542 = vmatprep.subr.mxu0 %v499_v12 }
  0xbb   : > { %v350_v37 = vmul.f32 %v1478_v15, %v341_v33  ;;  %v351_v38 = vmul.f32 %v1481_v16, %v340_v32  ;;  %543 = vmatpush1.msra.mxu0 %v498_v31 }
  0xbd   : > { %v497_v39 = vsel %vm495_vm2, %v351_v38, %v474_v36  ;;  %v496_v40 = vsel %vm495_vm2, %v350_v37, %v473_v34 }
  0xbe   : > { %544 = vmatprep.subr.mxu0 %v497_v39 }
  0xbf   : > { %545 = vmatpush1.msra.mxu0 %v496_v40 }
  0xc0   : > { %1014 = vmatmul.mubr.msk.f32.vlgmr.msra.gmra.mxu0 %vm504_vm9, %v323_v41 }
 0x180   : > { %v580_v43 = vpop.f32.mrf.mxu0 }
 0x181   : > { %v598_v47 = vmul.f32 %v580_v43, %v580_v43 }
 0x182   : > { %v582_v44 = vpop.f32.mrf.mxu0 }
 0x183   : > { %v599_v45 = vmul.f32 %v582_v44, %v582_v44  ;;  %v585_v46 = vadd.f32 %v582_v44, %v580_v43 }
 0x185   : > { %586 = vadd.xlane.f32.xlu0 %v585_v46  ;;  %v600_v48 = vadd.f32 %v599_v45, %v598_v47 }
 0x187   : > { %601 = vadd.xlane.f32.xlu1 %v600_v48 }
 0x198   : > { %630 = vperm.xlu1 %1094, %v326_v49  }
 0x19b   : > { %623 = vperm.xlu0 %1093, %v325_v50  }
 0x20e   : > { %v587_v51 = vpop.xlane.xlu0 %586 }
 0x20f   : > { %v588_v54 = vrot.slane %v587_v51, 4 }
 0x210   : > { %v602_v55 = vpop.xlane.xlu1 %601 }
 0x211   : > { %v589_v56 = vadd.f32 %v588_v54, %v587_v51  ;;  %v603_v57 = vrot.slane %v602_v55, 4 }
 0x213   : > { %v590_v58 = vrot.slane %v589_v56, 2  ;;  %v604_v59 = vadd.f32 %v603_v57, %v602_v55 }
 0x214   : > { %v631_v32 = vpop.permute.xlu1 %630 }
 0x215   : > { %v605_v60 = vrot.slane %v604_v59, 2  ;;  %v591_v61 = vadd.f32 %v590_v58, %v589_v56 }
 0x216   : > { %v624_v30 = vpop.permute.xlu0 %623 }
 0x217   : > { %v592_v62 = vrot.slane %v591_v61, 1  ;;  %v606_v63 = vadd.f32 %v605_v60, %v604_v59 }
 0x219   : > { %v593_v2 = vadd.f32 %v592_v62, %v591_v61  ;;  %v607_v4 = vrot.slane %v606_v63, 1 }
 0x21b   : > { %1023 = vpush %v593_v2  ;;  %v608_v8 = vadd.f32 %v607_v4, %v606_v63 }
 0x21d   : > { %1025 = vpush %v608_v8 }
 0x24c   : > { %s1024_s26 = spop %1023 }
 0x24d   : > { %v595_v9 = vstv %s1024_s26  ;;  %s313_s26 = scalar_lea.vmem [#allocation5], %s1007_s13 }
 0x24e   : > { %v597_v14 = vmul.f32 0.00048828125, %v595_v9  ;;  %s1026_s10 = spop %1025 }
 0x24f   : > { %v610_v17 = vstv %s1026_s10  ;;  %s930_s10 = sshll.u32 %s313_s26, 4  ;;  %s931_s10 = int_to_ptr.vmem [resolvable:$true] %s930_s10 }
 0x250   : > { %v611_v18 = vmul.f32 0.00048828125, %v610_v17  ;;  %v612_v20 = vmul.f32 %v597_v14, %v597_v14  ;;  %v615_v28 = vsub.f32 %v580_v43, %v597_v14  ;;  %v616_v10 = vsub.f32 %v582_v44, %v597_v14 }
 0x252   : > { %v613_v23 = vsub.f32 %v611_v18, %v612_v20 }
 0x254   : > { %v614_v25 = vmax.f32 %v613_v23, 0.0 }
 0x256   : > { %v617_v26 = vadd.f32 1e-05, %v614_v25 }
 0x258   : > { %1096 = vrsqrt.f32 %v617_v26 }
 0x265   : > { %v1097_v29 = vpop.eup %1096 }
 0x266   : > { %v619_v12 = vmul.f32 %v1097_v29, %v615_v28  ;;  %v620_v31 = vmul.f32 %v1097_v29, %v616_v10 }
 0x268   : > { %v626_v33 = vmul.f32 %v624_v30, %v619_v12  ;;  %v627_v34 = vmul.f32 %v624_v30, %v620_v31 }
 0x26a   : > { %v633_v36 = vadd.f32 %v631_v32, %v626_v33  ;;  %v634_v37 = vadd.f32 %v631_v32, %v627_v34 }
 0x26c   : > { %v637_v38 = vmul.f32 0.70710677, %v633_v36  ;;  %v638_v39 = vmul.f32 0.70710677, %v634_v37  ;;  %v635_v34 = vmul.f32 0.5, %v633_v36 }
 0x26e   : > { %v639_v40 = vand.u32 2147483647, %v637_v38  ;;  %v640_v41 = vand.u32 2147483647, %v638_v39  ;;  %vm679_vm10 = vcmp.ge.f32.partialorder %v637_v38, 0.0  ;;  %vm680_vm11 = vcmp.ge.f32.partialorder %v638_v39, 0.0 }
 0x270   : > { %v641_v42 = vmul.f32 0.3275911, %v639_v40  ;;  %v642_v45 = vmul.f32 0.3275911, %v640_v41  ;;  %v667_v43 = vsub.f32 0.0, %v639_v40  ;;  %v668_v44 = vsub.f32 0.0, %v640_v41 }
 0x272   : > { %v643_v46 = vadd.f32 1.0, %v641_v42  ;;  %v644_v47 = vadd.f32 1.0, %v642_v45  ;;  %v669_v48 = vmul.f32 %v667_v43, %v639_v40  ;;  %v670_v49 = vmul.f32 %v668_v44, %v640_v41 }
 0x274   : > { %1098 = vrcp.f32 %v643_v46  ;;  %v671_v55 = vmul.f32 1.442695, %v669_v48  ;;  %v673_v57 = vmul.f32 1.442695, %v670_v49  ;;  %v636_v46 = vmul.f32 0.5, %v634_v37 }
 0x275   : > { %1100 = vrcp.f32 %v644_v47 }
 0x276   : > { %1102 = vpow2.f32 %v671_v55 }
 0x277   : > { %1104 = vpow2.f32 %v673_v57 }
 0x281   : > { %v1099_v50 = vpop.eup %1098 }
 0x282   : > { %v1101_v51 = vpop.eup %1100  ;;  %v649_v54 = vmul.f32 1.0614054, %v1099_v50 }
 0x283   : > { %v650_v56 = vmul.f32 1.0614054, %v1101_v51  ;;  %v1103_v25 = vpop.eup %1102 }
 0x284   : > { %v651_v58 = vadd.f32 -1.4531521, %v649_v54  ;;  %v1105_v28 = vpop.eup %1104 }
 0x285   : > { %v652_v59 = vadd.f32 -1.4531521, %v650_v56 }
 0x286   : > { %v653_v60 = vmul.f32 %v1099_v50, %v651_v58 }
 0x287   : > { %v654_v61 = vmul.f32 %v1101_v51, %v652_v59 }
 0x288   : > { %v655_v62 = vadd.f32 1.4214138, %v653_v60 }
 0x289   : > { %v656_v63 = vadd.f32 1.4214138, %v654_v61 }
 0x28a   : > { %v657_v2 = vmul.f32 %v1099_v50, %v655_v62 }
 0x28b   : > { %v658_v4 = vmul.f32 %v1101_v51, %v656_v63 }
 0x28c   : > { %v659_v8 = vadd.f32 -0.28449672, %v657_v2 }
 0x28d   : > { %v660_v9 = vadd.f32 -0.28449672, %v658_v4 }
 0x28e   : > { %v661_v14 = vmul.f32 %v1099_v50, %v659_v8 }
 0x28f   : > { %v662_v17 = vmul.f32 %v1101_v51, %v660_v9 }
 0x290   : > { %v663_v18 = vadd.f32 0.2548296, %v661_v14 }
 0x291   : > { %v664_v20 = vadd.f32 0.2548296, %v662_v17 }
 0x292   : > { %v665_v23 = vmul.f32 %v1099_v50, %v663_v18 }
 0x293   : > { %v666_v26 = vmul.f32 %v1101_v51, %v664_v20 }
 0x294   : > { %v675_v10 = vmul.f32 %v1103_v25, %v665_v23 }
 0x295   : > { %v676_v29 = vmul.f32 %v1105_v28, %v666_v26 }
 0x296   : > { %v677_v30 = vsub.f32 1.0, %v675_v10 }
 0x297   : > { %v678_v12 = vsub.f32 1.0, %v676_v29 }
 0x298   : > { %v681_v31 = vsub.f32 0.0, %v677_v30 }
 0x299   : > { %v682_v32 = vsub.f32 0.0, %v678_v12 }
 0x29a   : > { %v683_v33 = vsel %vm679_vm10, %v677_v30, %v681_v31 }
 0x29b   : > { %v684_v40 = vsel %vm680_vm11, %v678_v12, %v682_v32  ;;  %v685_v41 = vadd.f32 1.0, %v683_v33 }
 0x29c   : > { %v686_v42 = vadd.f32 1.0, %v684_v40 }
 0x29d   : > { %v687_v45 = vmul.f32 %v685_v41, %v635_v34 }
 0x29e   : > { %v688_v47 = vmul.f32 %v686_v42, %v636_v46  ;;  %v328_v42 = vld [vmem:[%s1629_s7] sm:$0xf] }
 0x29f   : > { %721 = vrot.lane.b32.xlu0 %v687_v45, %s1209_s19  ;;  %745 = vrot.lane.b32.xlu1 %v687_v45, %s1207_s18 }
 0x2a3   : > { %713 = vrot.lane.b32.xlu0 %v687_v45, %s1211_s21  ;;  %747 = vrot.lane.b32.xlu1 %v688_v47, %s1207_s18 }
 0x2a7   : > { %705 = vrot.lane.b32.xlu0 %v687_v45, %s1214_s23  ;;  %737 = vrot.lane.b32.xlu1 %v687_v45, %s1208_s17 }
 0x2ab   : > { %697 = vrot.lane.b32.xlu0 %v687_v45, %s1212_s22  ;;  %739 = vrot.lane.b32.xlu1 %v688_v47, %s1208_s17 }
 0x2af   : > { %689 = vrot.lane.b32.xlu0 %v687_v45, %s1215_s24  ;;  %729 = vrot.lane.b32.xlu1 %v687_v45, %s1210_s20 }
 0x2b3   : > { %731 = vrot.lane.b32.xlu1 %v688_v47, %s1210_s20  ;;  %s916_s20 = scalar_lea.sflag [#allocation4], %s311_s12 }
 0x2b7   : > { %723 = vrot.lane.b32.xlu1 %v688_v47, %s1209_s19  ;;  %s928_s19 = scalar_lea.hbm %s1630_s8, %s1022_s25 }
 0x2bb   : > { %715 = vrot.lane.b32.xlu1 %v688_v47, %s1211_s21  ;;  %s1138_s21 = scalar_lea.vmem %s931_s10, 128 }
 0x2bc   : > { %p1139_p6 = scmp.ne.s32.totalorder %s931_s10, %s1138_s21 }
 0x2be   : > { %p1140_p9 = pnand %p1139_p6, %p1301_p5 }
 0x2bf   : > { %707 = vrot.lane.b32.xlu1 %v688_v47, %s1214_s23 }
 0x2c0   : > { %p1141_p10 = pneg %p1140_p9 }
 0x2c3   : > { %699 = vrot.lane.b32.xlu1 %v688_v47, %s1212_s22  ;;  %s1217_s22 = smov [#allocation5]  }
 0x2c7   : > { %691 = vrot.lane.b32.xlu1 %v688_v47, %s1215_s24 }
 0x311   : > { %v746_v36 = vpop.permute.xlu1 %745  ;;  %v722_v56 = vpop.permute.xlu0 %721 }
 0x315   : > { %v748_v37 = vpop.permute.xlu1 %747  ;;  %v714_v59 = vpop.permute.xlu0 %713 }
 0x316   : > { %v749_v38 = vsel %vm458_vm0, %v746_v36, %v748_v37  ;;  %v750_v39 = vsel %vm458_vm0, %v748_v37, %v746_v36 }
 0x317   : > { %v752_v43 = vmul.f32 %v1385_v13, %v750_v39  ;;  %v751_v44 = vmul.f32 %v1381_v11, %v749_v38 }
 0x319   : > { %771 = vmatprep.subr.mxu1 %v752_v43  ;;  %v738_v48 = vpop.permute.xlu1 %737  ;;  %v706_v4 = vpop.permute.xlu0 %705 }
 0x31a   : > { %772 = vmatpush1.msra.mxu1 %v751_v44 }
 0x31d   : > { %v740_v49 = vpop.permute.xlu1 %739  ;;  %v698_v18 = vpop.permute.xlu0 %697 }
 0x31e   : > { %v741_v50 = vsel %vm441_vm3, %v738_v48, %v740_v49  ;;  %v742_v51 = vsel %vm441_vm3, %v740_v49, %v738_v48 }
 0x31f   : > { %v743_v54 = vmul.f32 %v741_v50, %v1395_v19  ;;  %v744_v55 = vmul.f32 %v742_v51, %v1402_v22 }
 0x321   : > { %773 = vmatprep.subr.mxu1 %v744_v55  ;;  %v730_v57 = vpop.permute.xlu1 %729  ;;  %v690_v10 = vpop.permute.xlu0 %689 }
 0x322   : > { %774 = vmatpush1.msra.mxu1 %v743_v54 }
 0x325   : > { %v732_v13 = vpop.permute.xlu1 %731 }
 0x326   : > { %v733_v11 = vsel %vm424_vm4, %v730_v57, %v732_v13  ;;  %v734_v58 = vsel %vm424_vm4, %v732_v13, %v730_v57 }
 0x327   : > { %v735_v60 = vmul.f32 %v733_v11, %v1411_v27  ;;  %v736_v61 = vmul.f32 %v734_v58, %v1426_v35 }
 0x329   : > { %775 = vmatprep.subr.mxu1 %v736_v61  ;;  %v724_v19 = vpop.permute.xlu1 %723 }
 0x32a   : > { %v725_v22 = vsel %vm407_vm1, %v722_v56, %v724_v19  ;;  %v726_v62 = vsel %vm407_vm1, %v724_v19, %v722_v56  ;;  %776 = vmatpush1.msra.mxu1 %v735_v60 }
 0x32b   : > { %v727_v63 = vmul.f32 %v725_v22, %v1406_v24  ;;  %v728_v2 = vmul.f32 %v726_v62, %v1399_v21 }
 0x32d   : > { %777 = vmatprep.subr.mxu1 %v728_v2  ;;  %v716_v8 = vpop.permute.xlu1 %715 }
 0x32e   : > { %v717_v27 = vsel %vm390_vm5, %v714_v59, %v716_v8  ;;  %v718_v35 = vsel %vm390_vm5, %v716_v8, %v714_v59  ;;  %778 = vmatpush1.msra.mxu1 %v727_v63 }
 0x32f   : > { %v719_v9 = vmul.f32 %v718_v35, %v1440_v52  ;;  %v720_v14 = vmul.f32 %v717_v27, %v1443_v53  ;;  %779 = vmatprep.subr.mxu1 %v688_v47 }
 0x330   : > { %780 = vmatpush1.msra.mxu1 %v687_v45  ;;  %v327_v45 = vld [vmem:[%s1628_s6] sm:$0xf] }
 0x331   : > { %781 = vmatprep.subr.mxu1 %v720_v14  ;;  %v708_v24 = vpop.permute.xlu1 %707 }
 0x332   : > { %v709_v21 = vsel %vm373_vm7, %v706_v4, %v708_v24  ;;  %v710_v17 = vsel %vm373_vm7, %v708_v24, %v706_v4  ;;  %782 = vmatpush1.msra.mxu1 %v719_v9 }
 0x333   : > { %v711_v20 = vmul.f32 %v710_v17, %v1467_v6  ;;  %v712_v23 = vmul.f32 %v709_v21, %v1470_v7 }
 0x335   : > { %783 = vmatprep.subr.mxu1 %v712_v23  ;;  %v700_v52 = vpop.permute.xlu1 %699 }
 0x336   : > { %v701_v53 = vsel %vm356_vm6, %v698_v18, %v700_v52  ;;  %v702_v25 = vsel %vm356_vm6, %v700_v52, %v698_v18  ;;  %784 = vmatpush1.msra.mxu1 %v711_v20 }
 0x337   : > { %v703_v26 = vmul.f32 %v702_v25, %v1460_v3  ;;  %v704_v28 = vmul.f32 %v701_v53, %v1463_v1  ;;  %v324_v3 = vld [vmem:[%s1627_s5] sm:$0xf] }
 0x339   : > { %785 = vmatprep.subr.mxu1 %v704_v28  ;;  %v692_v29 = vpop.permute.xlu1 %691 }
 0x33a   : > { %v693_v6 = vsel %vm339_vm8, %v690_v10, %v692_v29  ;;  %v694_v7 = vsel %vm339_vm8, %v692_v29, %v690_v10  ;;  %786 = vmatpush1.msra.mxu1 %v703_v26 }
 0x33b   : > { %v695_v30 = vmul.f32 %v694_v7, %v1478_v15  ;;  %v696_v12 = vmul.f32 %v693_v6, %v1481_v16 }
 0x33d   : > { %787 = vmatprep.subr.mxu1 %v696_v12 }
 0x33e   : > { %788 = vmatpush1.msra.mxu1 %v695_v30 }
 0x33f   : > { %1015 = vmatmul.mubr.msk.f32.vlgmr.msra.gmra.mxu1 %vm753_vm12, %v324_v3 }
 0x3ff   : > { %v823_v1 = vpop.f32.mrf.mxu1 }
 0x400   : > { %v843_v31 = vmul.f32 %v823_v1, %v823_v1  ;;  %v828_v34 = vsel %vm495_vm2, %v823_v1, 0.0 }
 0x401   : > { %v825_v32 = vpop.f32.mrf.mxu1 }
 0x402   : > { %v829_v33 = vsel %vm495_vm2, %v825_v32, 0.0  ;;  %v844_v5 = vmul.f32 %v825_v32, %v825_v32  ;;  %v845_v15 = vsel %vm495_vm2, %v843_v31, 0.0 }
 0x403   : > { %v830_v40 = vadd.f32 %v829_v33, %v828_v34 }
 0x404   : > { %v846_v16 = vsel %vm495_vm2, %v844_v5, 0.0 }
 0x405   : > { %831 = vadd.xlane.f32.xlu0 %v830_v40  ;;  %v847_v41 = vadd.f32 %v846_v16, %v845_v15 }
 0x407   : > { %848 = vadd.xlane.f32.xlu1 %v847_v41 }
 0x418   : > { %877 = vperm.xlu1 %1094, %v328_v42  }
 0x41b   : > { %870 = vperm.xlu0 %1093, %v327_v45  }
 0x48e   : > { %v832_v46 = vpop.xlane.xlu0 %831 }
 0x48f   : > { %v833_v47 = vrot.slane %v832_v46, 4 }
 0x490   : > { %v849_v36 = vpop.xlane.xlu1 %848 }
 0x491   : > { %v834_v37 = vadd.f32 %v833_v47, %v832_v46  ;;  %v850_v38 = vrot.slane %v849_v36, 4 }
 0x493   : > { %v835_v39 = vrot.slane %v834_v37, 2  ;;  %v851_v43 = vadd.f32 %v850_v38, %v849_v36 }
 0x494   : > { %v878_v35 = vpop.permute.xlu1 %877 }
 0x495   : > { %v852_v44 = vrot.slane %v851_v43, 2  ;;  %v836_v48 = vadd.f32 %v835_v39, %v834_v37 }
 0x496   : > { %v871_v4 = vpop.permute.xlu0 %870 }
 0x497   : > { %v837_v49 = vrot.slane %v836_v48, 1  ;;  %v853_v50 = vadd.f32 %v852_v44, %v851_v43 }
 0x499   : > { %v838_v51 = vadd.f32 %v837_v49, %v836_v48  ;;  %v854_v54 = vrot.slane %v853_v50, 1 }
 0x49b   : > { %1027 = vpush %v838_v51  ;;  %v855_v55 = vadd.f32 %v854_v54, %v853_v50 }
 0x49d   : > { %1029 = vpush %v855_v55 }
 0x4cc   : > { %s1028_s23 = spop %1027 }
 0x4cd   : > { %v840_v56 = vstv %s1028_s23  ;;  %s1142_s23 = sshll.u32 %s1217_s22, 4  ;;  %s1143_s23 = int_to_ptr.vmem [resolvable:$false] %s1142_s23 }
 0x4ce   : > { %v842_v57 = vmul.f32 0.0009765625, %v840_v56  ;;  %s1030_s24 = spop %1029  ;;  %s1144_s9 = scalar_lea.vmem %s1143_s23, 256 }
 0x4cf   : > { %v857_v13 = vstv %s1030_s24  ;;  %p1145_p11 = scmp.lt.s32.totalorder %s931_s10, %s1143_s23  ;;  %p1146_p12 = scmp.lt.s32.totalorder %s1144_s9, %s1138_s21 }
 0x4d0   : > { %v858_v11 = vmul.f32 0.0009765625, %v857_v13  ;;  %v859_v58 = vmul.f32 %v842_v57, %v842_v57  ;;  %v862_v19 = vsub.f32 %v823_v1, %v842_v57  ;;  %v863_v22 = vsub.f32 %v825_v32, %v842_v57 }
 0x4d1   : > { %p1147_p13 = por %p1146_p12, %p1145_p11 }
 0x4d2   : > { %v860_v59 = vsub.f32 %v858_v11, %v859_v58 }
 0x4d3   : > { %p1148_p0 = pnand %p1147_p13, %p1141_p10 }
 0x4d4   : > { %v861_v60 = vmax.f32 %v860_v59, 0.0 }
 0x4d6   : > { %v864_v61 = vadd.f32 1e-05, %v861_v60 }
 0x4d8   : > { %1106 = vrsqrt.f32 %v864_v61 }
 0x4e5   : > { %v1107_v62 = vpop.eup %1106 }
 0x4e6   : > { %v866_v63 = vmul.f32 %v1107_v62, %v862_v19  ;;  %v867_v2 = vmul.f32 %v1107_v62, %v863_v22 }
 0x4e8   : > { %v873_v8 = vmul.f32 %v871_v4, %v866_v63  ;;  %v874_v27 = vmul.f32 %v871_v4, %v867_v2 }
 0x4ea   : > { %v880_v9 = vadd.f32 %v878_v35, %v873_v8  ;;  %v881_v14 = vadd.f32 %v878_v35, %v874_v27 }
 0x4ec   : > { %v884_v24 = vcombine.low %v880_v9, %v881_v14 }
 0x4ee   : > { %v886_v21 = vadd.f32 %v884_v24, %v1334_v0 }
 0x4f0   : > { %v888_v17 = vmul.f32 0.70710677, %v886_v21  ;;  %v887_v34 = vmul.f32 0.5, %v886_v21 }
 0x4f2   : > { %v889_v18 = vand.u32 2147483647, %v888_v17  ;;  %vm909_vm13 = vcmp.ge.f32.partialorder %v888_v17, 0.0 }
 0x4f4   : > { %v890_v20 = vmul.f32 0.3275911, %v889_v18  ;;  %v903_v52 = vsub.f32 0.0, %v889_v18 }
 0x4f6   : > { %v891_v23 = vadd.f32 1.0, %v890_v20  ;;  %v904_v53 = vmul.f32 %v903_v52, %v889_v18 }
 0x4f8   : > { %1108 = vrcp.f32 %v891_v23  ;;  %v905_v28 = vmul.f32 1.442695, %v904_v53 }
 0x4fa   : > { %1110 = vpow2.f32 %v905_v28 }
 0x505   : > { %v1109_v25 = vpop.eup %1108 }
 0x506   : > { %v894_v26 = vmul.f32 1.0614054, %v1109_v25 }
 0x507   : > { %v1111_v1 = vpop.eup %1110 }
 0x508   : > { %v895_v10 = vadd.f32 -1.4531521, %v894_v26 }
 0x50a   : > { %v896_v29 = vmul.f32 %v1109_v25, %v895_v10 }
 0x50c   : > { %v897_v6 = vadd.f32 1.4214138, %v896_v29 }
 0x50e   : > { %v898_v7 = vmul.f32 %v1109_v25, %v897_v6 }
 0x510   : > { %v899_v30 = vadd.f32 -0.28449672, %v898_v7 }
 0x512   : > { %v900_v12 = vmul.f32 %v1109_v25, %v899_v30 }
 0x514   : > { %v901_v0 = vadd.f32 0.2548296, %v900_v12 }
 0x516   : > { %v902_v3 = vmul.f32 %v1109_v25, %v901_v0 }
 0x518   : > { %v907_v31 = vmul.f32 %v1111_v1, %v902_v3 }
 0x51a   : > { %v908_v32 = vsub.f32 1.0, %v907_v31 }
 0x51c   : > { %v910_v33 = vsub.f32 0.0, %v908_v32 }
 0x51e   : > { %v911_v5 = vsel %vm909_vm13, %v908_v32, %v910_v33 }
 0x51f   : > { %v912_v40 = vadd.f32 1.0, %v911_v5 }
 0x521   : > { %v913_v15 = vmul.f32 %v912_v40, %v887_v34 }
 0x523   : > { %914 = vst [vmem:[%s313_s26] sm:$0xff] %v913_v15 }
 0x524   : > { %1151 = shalt.err (!%p1148_p0)
}
 0x525   : > { %s1152_s24 = scalar_lea.hbm %s928_s19, 128  ;;  %s1156_s25 = scalar_lea.hbm %s1630_s8, 256 }
 0x526   : > { %p1153_p1 = scmp.ne.s32.totalorder %s928_s19, %s1152_s24  ;;  %p1157_p4 = scmp.lt.s32.totalorder %s928_s19, %s1630_s8 }
 0x527   : > { %p1158_p7 = scmp.lt.s32.totalorder %s1156_s25, %s1152_s24 }
 0x528   : > { %p1154_p2 = pnand %p1153_p1, %p1301_p5 }
 0x529   : > { %p1159_p8 = por %p1158_p7, %p1157_p4 }
 0x52a   : > { %p1155_p3 = pneg %p1154_p2 }
 0x52c   : > { %p1160_p6 = pnand %p1159_p8, %p1155_p3 }
 0x52e   : > { %1163 = shalt.err (!%p1160_p6)
}
 0x52f   : > { %1035 = dma.vmem_to_hbm [thread:$0]  (%p1301_p5), %s931_s10, 128, %s928_s19, %s916_s20  }
 0x530 PF: > { %p1047_p9 = scmp.ge.s32.totalorder %s1202_s30, 2  ;;  %s942_s17 = sand.u32 1, %s1190_s27  }
 0x531   : > { %p1634_p10 = scmp.ne.s32.totalorder %s1632_s16, 0  ;;  %s943_s21 = scalar_lea.sflag [#allocation4], %s942_s17 }
 0x533   : > { %p1042_p11 = pnand %p1047_p9, %p1634_p10 }
 0x535   : > { %p1043_p12 = pneg %p1042_p11 }
 0x537   : > { %1185 = dma.done.wait (%p1043_p12), %s943_s21, 128  }
 0x538   : > { %1187 = vsyncadd (%p1043_p12), %s943_s21, 4294967168  ;;  %p19_p13 = scmp.ge.s32.totalorder %s1288_s11, 4   ;;  %s1635_s27 = smov %s1194_s28 }
 0x539   : > { %s1636_s28 = smov %s1198_s29  ;;  %s1637_s29 = smov %s1299_s14 }
 0x53a   : > { %s1638_s30 = smov %s1288_s11  ;;  %21 = sbr.rel (!%p19_p13) target bundleno = 4 (0x4), region = 92 }
 0x53f   :  { %948 = vsyncpa [#allocation3], 1 }
 0x540   :  { %950 = vsyncpa [#allocation3 + $0x1], 1 }
 0x541   :  { %951 = vsyncpa [#allocation4], 1 }
 0x542   :  { %953 = vsyncpa [#allocation4 + $0x1], 1 }

</bundles_post_ra>
